<compile_context>
chip_gen: v7x
topology: tpu7x:2x2x1
jax: 0.10.0
libtpu: 0.0.40
codegen_flags: <defaults>
</compile_context>

<pallas_src>
import math

import jax
import jax.numpy as jnp
from jax import lax
from jax.experimental import pallas as pl
from jax.experimental.pallas import tpu as pltpu


def _layernorm(x, w, b, eps=1e-5):
    mu = jnp.mean(x, axis=-1, keepdims=True)
    var = jnp.mean((x - mu) ** 2, axis=-1, keepdims=True)
    return (x - mu) * lax.rsqrt(var + eps) * w + b


def _gelu_tanh(x):
    c = math.sqrt(2.0 / math.pi)
    return 0.5 * x * (1.0 + jnp.tanh(c * (x + 0.044715 * x * x * x)))


# ---------------------------------------------------------------------------
# Kernel 1: fused LayerNorm(ln_1) + QKV projection.
# Emits q (pre-scaled by 1/sqrt(hd)), k, v in head-major (B, H, T, hd) bf16
# layout via a single reshape+transpose store per tensor (no per-head masked
# lane-sliced stores).
# ---------------------------------------------------------------------------
def _make_qkv_kernel(n_head, head_dim, scale):
    C = n_head * head_dim

    def kernel(x_ref, ln1w_ref, ln1b_ref, wattn_ref, battn_ref,
               q_ref, k_ref, v_ref):
        tt = x_ref.shape[1]
        x = x_ref[0].astype(jnp.float32)                          # (tt, C)
        h = _layernorm(x, ln1w_ref[0], ln1b_ref[0])
        qkv = jnp.dot(h.astype(jnp.bfloat16), wattn_ref[...],
                      preferred_element_type=jnp.float32) + battn_ref[0]
        # Fold 1/sqrt(hd) into q once (cheaper than scaling logits per tile).
        q = (qkv[:, 0 * C:1 * C] * scale).reshape(tt, n_head, head_dim)
        k = qkv[:, 1 * C:2 * C].reshape(tt, n_head, head_dim)
        v = qkv[:, 2 * C:3 * C].reshape(tt, n_head, head_dim)
        # One head-major relayout store per tensor: (tt, H, hd) -> (H, tt, hd)
        q_ref[0] = jnp.transpose(q, (1, 0, 2)).astype(q_ref.dtype)
        k_ref[0] = jnp.transpose(k, (1, 0, 2)).astype(k_ref.dtype)
        v_ref[0] = jnp.transpose(v, (1, 0, 2)).astype(v_ref.dtype)

    return kernel


# ---------------------------------------------------------------------------
# Kernel 2: head-batched flash-style causal attention + full-C c_proj +
# residual + ln_2 + MLP + residual, over grid (B, n_q_tiles, n_kv_tiles).
# ---------------------------------------------------------------------------
def _make_block_kernel(n_head, head_dim, tq, tk):
    C = n_head * head_dim
    NEG = -1e30  # large finite negative (avoids inf-inf NaN risk)

    def kernel(x_ref, q_ref, k_ref, v_ref,
               wap_ref, bap_ref, ln2w_ref, ln2b_ref,
               wfc_ref, bfc_ref, wmp_ref, bmp_ref,
               o_ref,
               m_sc, l_sc, acc_sc):
        qi = pl.program_id(1)
        ki = pl.program_id(2)
        n_k = pl.num_programs(2)

        @pl.when(ki == 0)
        def _init():
            m_sc[...] = jnp.full_like(m_sc, NEG)
            l_sc[...] = jnp.zeros_like(l_sc)
            acc_sc[...] = jnp.zeros_like(acc_sc)

        @pl.when(ki <= qi)   # causal: fully-masked kv tiles do no compute
        def _update():
            q = q_ref[0]                        # (H, tq, hd) bf16, pre-scaled
            k = k_ref[0]                        # (H, tk, hd) bf16
            v = v_ref[0]                        # (H, tk, hd) bf16
            # Head-batched QK^T -> (H, tq, tk), f32 accumulation on the MXU.
            s = lax.dot_general(q, k, (((2,), (2,)), ((0,), (0,))),
                                preferred_element_type=jnp.float32)
            row = qi * tq + lax.broadcasted_iota(jnp.int32, (tq, tk), 0)
            col = ki * tk + lax.broadcasted_iota(jnp.int32, (tq, tk), 1)
            # TODO(synk): the source uses masked_fill(..., float('inf')) which
            # would NaN the softmax; implementing the intended causal mask
            # (large-negative additive bias, standard GPT-2) instead.
            s = s + jnp.where(col <= row, 0.0, NEG)[None, :, :]

            m_prev = m_sc[...]
            m_new = jnp.maximum(m_prev, jnp.max(s, axis=-1, keepdims=True))
            alpha = jnp.exp(m_prev - m_new)
            p = jnp.exp(s - m_new)
            l_sc[...] = alpha * l_sc[...] + jnp.sum(p, axis=-1, keepdims=True)
            acc_sc[...] = alpha * acc_sc[...] + lax.dot_general(
                p.astype(v.dtype), v, (((2,), (1,)), ((0,), (0,))),
                preferred_element_type=jnp.float32)          # (H, tq, hd)
            m_sc[...] = m_new

        @pl.when(ki == n_k - 1)
        def _finalize():
            # Normalize all heads, concatenate head-major along lanes (static,
            # once per q-tile), then ONE (tq, C) @ (C, C) c_proj matmul.
            y = acc_sc[...] * pl.reciprocal(l_sc[...], approx=True)  # (H,tq,hd)
            y_cat = jnp.concatenate([y[hh] for hh in range(n_head)], axis=-1)
            att = jnp.dot(y_cat.astype(jnp.bfloat16), wap_ref[...],
                          preferred_element_type=jnp.float32) + bap_ref[0]

            xv = x_ref[0].astype(jnp.float32)                 # (tq, C)
            x1 = xv + att                                     # + attn residual
            h2 = _layernorm(x1, ln2w_ref[0], ln2b_ref[0])
            f = jnp.dot(h2.astype(jnp.bfloat16), wfc_ref[...],
                        preferred_element_type=jnp.float32) + bfc_ref[0]
            f = _gelu_tanh(f)
            mo = jnp.dot(f.astype(jnp.bfloat16), wmp_ref[...],
                         preferred_element_type=jnp.float32) + bmp_ref[0]
            o_ref[0] = (x1 + mo).astype(o_ref.dtype)

    return kernel


def _pick_vmem_limit():
    """Generation-aware scoped-VMEM limit."""
    try:
        kind = jax.devices()[0].device_kind.lower()
    except Exception:  # pragma: no cover - defensive
        kind = ""
    if "v5" in kind or "v6" in kind:
        return 100 * 1024 * 1024      # 128 MiB physical VMEM -> generous cap
    return 48 * 1024 * 1024           # v7x (64 MiB physical) / conservative


def gpt_block(x, params, n_head, *, seq_tile=256, vmem_limit_bytes=None):
    (ln1_w, ln1_b, w_attn, b_attn, w_aproj, b_aproj,
     ln2_w, ln2_b, w_fc, b_fc, w_mproj, b_mproj) = params
    B, T, C = x.shape
    assert C % n_head == 0
    hd = C // n_head
    scale = 1.0 / math.sqrt(hd)

    if vmem_limit_bytes is None:
        vmem_limit_bytes = _pick_vmem_limit()

    tt = T if T <= seq_tile else seq_tile
    assert T % tt == 0, "T must be divisible by the sequence tile"
    n_t = T // tt

    # bf16 weights for the MXU (accumulation stays f32); biases/LN stay f32.
    w_attn_b = w_attn.astype(jnp.bfloat16)
    w_aproj_b = w_aproj.astype(jnp.bfloat16)
    w_fc_b = w_fc.astype(jnp.bfloat16)
    w_mproj_b = w_mproj.astype(jnp.bfloat16)

    # ---------------- pass 1: ln_1 + QKV projection ----------------
    def _const2(shape):
        z = (0,) * len(shape)
        return pl.BlockSpec(shape, lambda b, t: z)

    qkv_struct = jax.ShapeDtypeStruct((B, n_head, T, hd), jnp.bfloat16)
    qkv_out_spec = pl.BlockSpec((1, n_head, tt, hd), lambda b, t: (b, 0, t, 0))
    q4, k4, v4 = pl.pallas_call(
        _make_qkv_kernel(n_head, hd, scale),
        out_shape=(qkv_struct, qkv_struct, qkv_struct),
        grid=(B, n_t),
        in_specs=[
            pl.BlockSpec((1, tt, C), lambda b, t: (b, t, 0)),   # x
            _const2((1, C)), _const2((1, C)),                   # ln_1 w, b
            _const2((C, 3 * C)), _const2((1, 3 * C)),           # c_attn W^T, b
        ],
        out_specs=(qkv_out_spec, qkv_out_spec, qkv_out_spec),
        compiler_params=pltpu.CompilerParams(
            dimension_semantics=("parallel", "parallel"),
            vmem_limit_bytes=vmem_limit_bytes),
    )(x, ln1_w, ln1_b, w_attn_b, b_attn)

    # ---------------- pass 2: attention + proj + residual + ln_2 + MLP ------
    tq = tk = tt
    n_q = n_k = n_t

    def _const3(shape):
        z = (0,) * len(shape)
        return pl.BlockSpec(shape, lambda b, q, k: z)

    # Causal DMA clamp: masked kv tiles (k > q) map to the already-resident
    # block so no new K/V DMA is issued for them.
    kv_spec = pl.BlockSpec((1, n_head, tk, hd),
                           lambda b, q, k: (b, 0, jnp.minimum(k, q), 0))

    out = pl.pallas_call(
        _make_block_kernel(n_head, hd, tq, tk),
        out_shape=jax.ShapeDtypeStruct((B, T, C), x.dtype),
        grid=(B, n_q, n_k),
        in_specs=[
            pl.BlockSpec((1, tq, C), lambda b, q, k: (b, q, 0)),            # x
            pl.BlockSpec((1, n_head, tq, hd), lambda b, q, k: (b, 0, q, 0)),  # q
            kv_spec,                                                          # k
            kv_spec,                                                          # v
            _const3((C, C)),                                     # attn c_proj W^T
            _const3((1, C)),                                     # attn c_proj b
            _const3((1, C)), _const3((1, C)),                    # ln_2 w, b
            _const3((C, 4 * C)), _const3((1, 4 * C)),            # c_fc W^T, b
            _const3((4 * C, C)), _const3((1, C)),                # mlp c_proj W^T, b
        ],
        out_specs=pl.BlockSpec((1, tq, C), lambda b, q, k: (b, q, 0)),
        scratch_shapes=[
            pltpu.VMEM((n_head, tq, 1), jnp.float32),    # running max m
            pltpu.VMEM((n_head, tq, 1), jnp.float32),    # running sum l
            pltpu.VMEM((n_head, tq, hd), jnp.float32),   # per-head output acc
        ],
        compiler_params=pltpu.CompilerParams(
            dimension_semantics=("parallel", "parallel", "arbitrary"),
            vmem_limit_bytes=vmem_limit_bytes),
    )(x, q4, k4, v4, w_aproj_b, b_aproj, ln2_w, ln2_b,
      w_fc_b, b_fc, w_mproj_b, b_mproj)
    return out


# ---------------------------------------------------------------------------
# Pure-JAX reference (f32) for correctness checking.
# ---------------------------------------------------------------------------
def reference_block(x, params, n_head):
    (ln1_w, ln1_b, w_attn, b_attn, w_aproj, b_aproj,
     ln2_w, ln2_b, w_fc, b_fc, w_mproj, b_mproj) = params
    B, T, C = x.shape
    hd = C // n_head

    h = _layernorm(x, ln1_w[0], ln1_b[0])
    qkv = h @ w_attn + b_attn[0]
    q, k, v = jnp.split(qkv, 3, axis=-1)
    q = q.reshape(B, T, n_head, hd).transpose(0, 2, 1, 3)
    k = k.reshape(B, T, n_head, hd).transpose(0, 2, 1, 3)
    v = v.reshape(B, T, n_head, hd).transpose(0, 2, 1, 3)
    att = jnp.einsum('bhqd,bhkd->bhqk', q, k) / math.sqrt(hd)
    mask = jnp.tril(jnp.ones((T, T), dtype=bool))
    att = jnp.where(mask, att, -jnp.inf)
    att = jax.nn.softmax(att, axis=-1)
    y = jnp.einsum('bhqk,bhkd->bhqd', att, v)
    y = y.transpose(0, 2, 1, 3).reshape(B, T, C)
    y = y @ w_aproj + b_aproj[0]
    x = x + y

    h2 = _layernorm(x, ln2_w[0], ln2_b[0])
    f = _gelu_tanh(h2 @ w_fc + b_fc[0])
    x = x + (f @ w_mproj + b_mproj[0])
    return x


if __name__ == "__main__":
    B, T, C, n_head = 2, 8, 32, 4   # small GPT-style config (head_dim = 8)

    key = jax.random.PRNGKey(0)
    keys = jax.random.split(key, 8)

    x = jax.random.normal(keys[0], (B, T, C), dtype=jnp.float32)

    std = 0.02
    params = (
        jnp.ones((1, C), jnp.float32),                                   # ln_1 weight
        jnp.zeros((1, C), jnp.float32),                                  # ln_1 bias
        std * jax.random.normal(keys[1], (C, 3 * C), jnp.float32),       # c_attn W^T
        std * jax.random.normal(keys[2], (1, 3 * C), jnp.float32),       # c_attn b
        std * jax.random.normal(keys[3], (C, C), jnp.float32),           # attn c_proj W^T
        jnp.zeros((1, C), jnp.float32),                                  # attn c_proj b
        jnp.ones((1, C), jnp.float32),                                   # ln_2 weight
        jnp.zeros((1, C), jnp.float32),                                  # ln_2 bias
        std * jax.random.normal(keys[4], (C, 4 * C), jnp.float32),       # c_fc W^T
        std * jax.random.normal(keys[5], (1, 4 * C), jnp.float32),       # c_fc b
        std * jax.random.normal(keys[6], (4 * C, C), jnp.float32),       # mlp c_proj W^T
        jnp.zeros((1, C), jnp.float32),                                  # mlp c_proj b
    )

    out = jax.block_until_ready(gpt_block(x, params, n_head))

    # Reference uses the same bf16-rounded weights the kernel consumes, so the
    # comparison only measures kernel math (bf16 activations, approx recip).
    eff = list(params)
    for idx in (2, 4, 8, 10):
        eff[idx] = eff[idx].astype(jnp.bfloat16).astype(jnp.float32)
    ref = jax.block_until_ready(reference_block(x, tuple(eff), n_head))

    assert out.shape == (B, T, C)
    err = float(jnp.max(jnp.abs(out - ref)))
    assert jnp.allclose(out, ref, atol=3e-3, rtol=3e-3), (
        f"mismatch vs reference, max abs err = {err}")

    print("KERNEL_OK")
</pallas_src>

<mosaic_0001>
module attributes {stable_mosaic.version = 11 : i64} {
  func.func @kernel(%arg0: i32, %arg1: i32, %arg2: memref<1x8x32xf32, #tpu.memory_space<vmem>>, %arg3: memref<1x32xf32, #tpu.memory_space<vmem>>, %arg4: memref<1x32xf32, #tpu.memory_space<vmem>>, %arg5: memref<32x96xbf16, #tpu.memory_space<vmem>>, %arg6: memref<1x96xf32, #tpu.memory_space<vmem>>, %arg7: memref<1x4x8x8xbf16, #tpu.memory_space<vmem>>, %arg8: memref<1x4x8x8xbf16, #tpu.memory_space<vmem>>, %arg9: memref<1x4x8x8xbf16, #tpu.memory_space<vmem>>) attributes {dimension_semantics = [#tpu.dimension_semantics<parallel>, #tpu.dimension_semantics<parallel>], iteration_bounds = array<i64: 2, 1>, scalar_prefetch = 0 : i64, scratch_operands = 0 : i64, tpu.core_type = #tpu.core_type<tc>, window_params = [{transform_indices = @transform_0, window_bounds = array<i64: 1, 8, 32>}, {pipeline_mode = #tpu.pipeline_mode<synchronous>, transform_indices = @transform_1, window_bounds = array<i64: 1, 32>}, {pipeline_mode = #tpu.pipeline_mode<synchronous>, transform_indices = @transform_2, window_bounds = array<i64: 1, 32>}, {pipeline_mode = #tpu.pipeline_mode<synchronous>, transform_indices = @transform_3, window_bounds = array<i64: 32, 96>}, {pipeline_mode = #tpu.pipeline_mode<synchronous>, transform_indices = @transform_4, window_bounds = array<i64: 1, 96>}, {transform_indices = @transform_5, window_bounds = array<i64: 1, 4, 8, 8>}, {transform_indices = @transform_6, window_bounds = array<i64: 1, 4, 8, 8>}, {transform_indices = @transform_7, window_bounds = array<i64: 1, 4, 8, 8>}]} {
    %c0 = arith.constant 0 : index
    %c0_0 = arith.constant 0 : index
    %c0_1 = arith.constant 0 : index
    %0 = vector.load %arg2[%c0, %c0_0, %c0_1] : memref<1x8x32xf32, #tpu.memory_space<vmem>>, vector<1x8x32xf32>
    %1 = vector.shape_cast %0 : vector<1x8x32xf32> to vector<8x32xf32>
    %c0_2 = arith.constant 0 : index
    %c0_3 = arith.constant 0 : index
    %2 = vector.load %arg3[%c0_2, %c0_3] : memref<1x32xf32, #tpu.memory_space<vmem>>, vector<1x32xf32>
    %3 = vector.shape_cast %2 : vector<1x32xf32> to vector<32xf32>
    %c0_4 = arith.constant 0 : index
    %c0_5 = arith.constant 0 : index
    %4 = vector.load %arg4[%c0_4, %c0_5] : memref<1x32xf32, #tpu.memory_space<vmem>>, vector<1x32xf32>
    %5 = vector.shape_cast %4 : vector<1x32xf32> to vector<32xf32>
    %cst = arith.constant dense<0.000000e+00> : vector<8xf32>
    %6 = vector.multi_reduction <add>, %1, %cst [1] : vector<8x32xf32> to vector<8xf32>
    %7 = vector.shape_cast %6 : vector<8xf32> to vector<8x1xf32>
    %cst_6 = arith.constant 3.200000e+01 : f32
    %8 = vector.broadcast %cst_6 : f32 to vector<8x1xf32>
    %9 = arith.divf %7, %8 : vector<8x1xf32>
    %10 = vector.broadcast %9 : vector<8x1xf32> to vector<8x32xf32>
    %11 = arith.subf %1, %10 : vector<8x32xf32>
    %12 = arith.mulf %11, %11 : vector<8x32xf32>
    %cst_7 = arith.constant dense<0.000000e+00> : vector<8xf32>
    %13 = vector.multi_reduction <add>, %12, %cst_7 [1] : vector<8x32xf32> to vector<8xf32>
    %14 = vector.shape_cast %13 : vector<8xf32> to vector<8x1xf32>
    %cst_8 = arith.constant 3.200000e+01 : f32
    %15 = vector.broadcast %cst_8 : f32 to vector<8x1xf32>
    %16 = arith.divf %14, %15 : vector<8x1xf32>
    %17 = vector.broadcast %9 : vector<8x1xf32> to vector<8x32xf32>
    %18 = arith.subf %1, %17 : vector<8x32xf32>
    %cst_9 = arith.constant 9.99999974E-6 : f32
    %19 = vector.broadcast %cst_9 : f32 to vector<8x1xf32>
    %20 = arith.addf %16, %19 : vector<8x1xf32>
    %21 = math.rsqrt %20 : vector<8x1xf32>
    %22 = vector.broadcast %21 : vector<8x1xf32> to vector<8x32xf32>
    %23 = arith.mulf %18, %22 : vector<8x32xf32>
    %24 = vector.shape_cast %3 : vector<32xf32> to vector<1x32xf32>
    %25 = vector.broadcast %24 : vector<1x32xf32> to vector<8x32xf32>
    %26 = arith.mulf %23, %25 : vector<8x32xf32>
    %27 = vector.shape_cast %5 : vector<32xf32> to vector<1x32xf32>
    %28 = vector.broadcast %27 : vector<1x32xf32> to vector<8x32xf32>
    %29 = arith.addf %26, %28 : vector<8x32xf32>
    %30 = arith.truncf %29 : vector<8x32xf32> to vector<8x32xbf16>
    %c0_10 = arith.constant 0 : index
    %c0_11 = arith.constant 0 : index
    %31 = vector.load %arg5[%c0_10, %c0_11] : memref<32x96xbf16, #tpu.memory_space<vmem>>, vector<32x96xbf16>
    %cst_12 = arith.constant dense<0.000000e+00> : vector<8x96xf32>
    %32 = tpu.matmul %30, %31, %cst_12 {dimension_numbers = #tpu.dot_dimension_numbers<[1], [0], [0], [1], [0, 0, 1, 1], [], []>} : vector<8x32xbf16>, vector<32x96xbf16>, vector<8x96xf32> -> vector<8x96xf32>
    %c0_13 = arith.constant 0 : index
    %c0_14 = arith.constant 0 : index
    %33 = vector.load %arg6[%c0_13, %c0_14] : memref<1x96xf32, #tpu.memory_space<vmem>>, vector<1x96xf32>
    %34 = vector.shape_cast %33 : vector<1x96xf32> to vector<96xf32>
    %35 = vector.shape_cast %34 : vector<96xf32> to vector<1x96xf32>
    %36 = vector.broadcast %35 : vector<1x96xf32> to vector<8x96xf32>
    %37 = arith.addf %32, %36 : vector<8x96xf32>
    %38 = vector.extract_strided_slice %37 {offsets = [0, 0], sizes = [8, 32], strides = [1, 1]} : vector<8x96xf32> to vector<8x32xf32>
    %cst_15 = arith.constant 0.353553385 : f32
    %39 = vector.broadcast %cst_15 : f32 to vector<8x32xf32>
    %40 = arith.mulf %38, %39 : vector<8x32xf32>
    %41 = vector.shape_cast %40 : vector<8x32xf32> to vector<8x4x8xf32>
    %42 = vector.extract_strided_slice %37 {offsets = [0, 32], sizes = [8, 32], strides = [1, 1]} : vector<8x96xf32> to vector<8x32xf32>
    %43 = vector.shape_cast %42 : vector<8x32xf32> to vector<8x4x8xf32>
    %44 = vector.extract_strided_slice %37 {offsets = [0, 64], sizes = [8, 32], strides = [1, 1]} : vector<8x96xf32> to vector<8x32xf32>
    %45 = vector.shape_cast %44 : vector<8x32xf32> to vector<8x4x8xf32>
    %46 = tpu.transpose %41, [1, 0, 2] : vector<8x4x8xf32> -> vector<4x8x8xf32>
    %47 = arith.truncf %46 : vector<4x8x8xf32> to vector<4x8x8xbf16>
    %c0_16 = arith.constant 0 : index
    %c0_17 = arith.constant 0 : index
    %c0_18 = arith.constant 0 : index
    %c0_19 = arith.constant 0 : index
    %48 = vector.load %arg7[%c0_16, %c0_17, %c0_18, %c0_19] : memref<1x4x8x8xbf16, #tpu.memory_space<vmem>>, vector<1x4x8x8xbf16>
    %49 = vector.shape_cast %48 : vector<1x4x8x8xbf16> to vector<4x8x8xbf16>
    %50 = vector.shape_cast %47 : vector<4x8x8xbf16> to vector<1x4x8x8xbf16>
    tpu.vector_store %arg7[%c0_16, %c0_17, %c0_18, %c0_19], %50 {strides = array<i32>} : memref<1x4x8x8xbf16, #tpu.memory_space<vmem>>, vector<1x4x8x8xbf16>,
    %51 = tpu.transpose %43, [1, 0, 2] : vector<8x4x8xf32> -> vector<4x8x8xf32>
    %52 = arith.truncf %51 : vector<4x8x8xf32> to vector<4x8x8xbf16>
    %c0_20 = arith.constant 0 : index
    %c0_21 = arith.constant 0 : index
    %c0_22 = arith.constant 0 : index
    %c0_23 = arith.constant 0 : index
    %53 = vector.load %arg8[%c0_20, %c0_21, %c0_22, %c0_23] : memref<1x4x8x8xbf16, #tpu.memory_space<vmem>>, vector<1x4x8x8xbf16>
    %54 = vector.shape_cast %53 : vector<1x4x8x8xbf16> to vector<4x8x8xbf16>
    %55 = vector.shape_cast %52 : vector<4x8x8xbf16> to vector<1x4x8x8xbf16>
    tpu.vector_store %arg8[%c0_20, %c0_21, %c0_22, %c0_23], %55 {strides = array<i32>} : memref<1x4x8x8xbf16, #tpu.memory_space<vmem>>, vector<1x4x8x8xbf16>,
    %56 = tpu.transpose %45, [1, 0, 2] : vector<8x4x8xf32> -> vector<4x8x8xf32>
    %57 = arith.truncf %56 : vector<4x8x8xf32> to vector<4x8x8xbf16>
    %c0_24 = arith.constant 0 : index
    %c0_25 = arith.constant 0 : index
    %c0_26 = arith.constant 0 : index
    %c0_27 = arith.constant 0 : index
    %58 = vector.load %arg9[%c0_24, %c0_25, %c0_26, %c0_27] : memref<1x4x8x8xbf16, #tpu.memory_space<vmem>>, vector<1x4x8x8xbf16>
    %59 = vector.shape_cast %58 : vector<1x4x8x8xbf16> to vector<4x8x8xbf16>
    %60 = vector.shape_cast %57 : vector<4x8x8xbf16> to vector<1x4x8x8xbf16>
    tpu.vector_store %arg9[%c0_24, %c0_25, %c0_26, %c0_27], %60 {strides = array<i32>} : memref<1x4x8x8xbf16, #tpu.memory_space<vmem>>, vector<1x4x8x8xbf16>,
    return
  }
  func.func @transform_0(%arg0: i32, %arg1: i32) -> (i32, i32, i32) {
    %c0_i32 = arith.constant 0 : i32
    %c0_i32_0 = arith.constant 0 : i32
    return %arg0, %arg1, %c0_i32 : i32, i32, i32
  }
  func.func @transform_1(%arg0: i32, %arg1: i32) -> (i32, i32) {
    %c0_i32 = arith.constant 0 : i32
    %c0_i32_0 = arith.constant 0 : i32
    %c0_i32_1 = arith.constant 0 : i32
    return %c0_i32, %c0_i32_0 : i32, i32
  }
  func.func @transform_2(%arg0: i32, %arg1: i32) -> (i32, i32) {
    %c0_i32 = arith.constant 0 : i32
    %c0_i32_0 = arith.constant 0 : i32
    %c0_i32_1 = arith.constant 0 : i32
    return %c0_i32, %c0_i32_0 : i32, i32
  }
  func.func @transform_3(%arg0: i32, %arg1: i32) -> (i32, i32) {
    %c0_i32 = arith.constant 0 : i32
    %c0_i32_0 = arith.constant 0 : i32
    %c0_i32_1 = arith.constant 0 : i32
    return %c0_i32, %c0_i32_0 : i32, i32
  }
  func.func @transform_4(%arg0: i32, %arg1: i32) -> (i32, i32) {
    %c0_i32 = arith.constant 0 : i32
    %c0_i32_0 = arith.constant 0 : i32
    %c0_i32_1 = arith.constant 0 : i32
    return %c0_i32, %c0_i32_0 : i32, i32
  }
  func.func @transform_5(%arg0: i32, %arg1: i32) -> (i32, i32, i32, i32) {
    %c0_i32 = arith.constant 0 : i32
    %c0_i32_0 = arith.constant 0 : i32
    %c0_i32_1 = arith.constant 0 : i32
    return %arg0, %c0_i32, %arg1, %c0_i32_0 : i32, i32, i32, i32
  }
  func.func @transform_6(%arg0: i32, %arg1: i32) -> (i32, i32, i32, i32) {
    %c0_i32 = arith.constant 0 : i32
    %c0_i32_0 = arith.constant 0 : i32
    %c0_i32_1 = arith.constant 0 : i32
    return %arg0, %c0_i32, %arg1, %c0_i32_0 : i32, i32, i32, i32
  }
  func.func @transform_7(%arg0: i32, %arg1: i32) -> (i32, i32, i32, i32) {
    %c0_i32 = arith.constant 0 : i32
    %c0_i32_0 = arith.constant 0 : i32
    %c0_i32_1 = arith.constant 0 : i32
    return %arg0, %c0_i32, %arg1, %c0_i32_0 : i32, i32, i32, i32
  }
}

</mosaic_0001>

<bundles_post_ra>
// kernel: tpu_custom_call.1
= control target key start
LH: loop header
LB: loop body
LE: loop exit
PB: predicated region body
PF: predicated region fallthrough
CT: control target
= control target key end

     0   :  { %s1949_s0 = inlined_call_operand.hbm [shape: f32[2,8,32], index: 0, kind: input, shape index: {}]   ;;  %s1950_s1 = inlined_call_operand.vmem [shape: f32[1,32], index: 1, kind: input, shape index: {}]   ;;  %s1951_s2 = inlined_call_operand.vmem [shape: f32[1,32], index: 2, kind: input, shape index: {}]   ;;  %s1952_s3 = inlined_call_operand.hbm [shape: bf16[32,96], index: 3, kind: input, shape index: {}]   ;;  %s1953_s4 = inlined_call_operand.vmem [shape: f32[1,96], index: 4, kind: input, shape index: {}]   ;;  %s1954_s5 = inlined_call_operand.hbm [shape: bf16[2,4,8,8], index: 5, kind: output, shape index: {0}]   ;;  %s1955_s6 = inlined_call_operand.hbm [shape: bf16[2,4,8,8], index: 6, kind: output, shape index: {1}]   ;;  %s1956_s7 = inlined_call_operand.hbm [shape: bf16[2,4,8,8], index: 7, kind: output, shape index: {2}]  }
   0x1   :  { %1962 = sst [smem:[#allocation16_spill]] %s1952_s3 }
   0x2   :  { %13 = vsyncpa [#allocation3], 0 }
   0x3   :  { %15 = vsyncpa [#allocation3 + $0x1], 0 }
   0x4   :  { %16 = vsyncpa [#allocation6], 0 }
   0x5   :  { %17 = vsyncpa [#allocation4], 0 }
   0x6   :  { %19 = vsyncpa [#allocation4 + $0x1], 0 }
   0x7   :  { %20 = vsyncpa [#allocation9], 0 }
   0x8   :  { %22 = vsyncpa [#allocation9 + $0x1], 0  ;;  %s1553_s24 = smov 0   ;;  %s1555_s25 = smov 0  }
   0x9   :  { %s1557_s26 = smov 0   ;;  %s1559_s27 = smov 0  }
   0xa   :  { %s1561_s28 = smov 0   ;;  %s1563_s29 = smov 0  }
   0xb LB: > { %s1584_s30 = sadd.s32 4294967295, %s1494_s29   ;;  %s1960_s8 = sadd.s32 4294967294, %s1494_s29   ;;  %s1494_s29 = sphi %s1563_s29, %s28_s29   ;;  %s1490_s28 = sphi %s1561_s28, %s1985_s28   ;;  %s1486_s27 = sphi %s1559_s27, %s1984_s27   ;;  %s1482_s26 = sphi %s1557_s26, %s1983_s26   ;;  %s1478_s25 = sphi %s1555_s25, %s1982_s25   ;;  %s1474_s24 = sphi %s1553_s24, %s1981_s24  }
   0xc   : > { %p62_p0 = scmp.ne.s32.totalorder %s1478_s25, %s1474_s24  ;;  %p1957_p1 = scmp.eq.s32.totalorder %s1584_s30, 0 }
   0xd   : > { %p178_p3 = scmp.eq.s32.totalorder %s1960_s8, 1  ;;  %p1143_p5 = scmp.ge.s32.totalorder %s1494_s29, 1 }
   0xe   : > { %p1595_p4 = por %p1957_p1, %p62_p0  ;;  %p241_p7 = scmp.lt.s32.totalorder %s1494_s29, 3 }
   0xf   : > { %p1600_p6 = por %p178_p3, %p62_p0  ;;  %s1496_s12 = smov [#allocation5]  }
  0x10   : > { %s1963_s9 = scalar_select %p1595_p4, 1, 0 }
  0x11   : > { %s1964_s10 = scalar_select %p1600_p6, 1, 0 }
  0x12   : > { %p1605_p8 = pnand %p1143_p5, %p241_p7  ;;  %s259_s13 = sshll.u32 %s1496_s12, 4  ;;  %s260_s13 = int_to_ptr.vmem [resolvable:$true] %s259_s13 }
  0x13   : > { %s40_s15 = sadd.s32 1, %s1490_s28  ;;  %s1967_s3 = sld [smem:[#allocation16_spill]] }
  0x14   : > { %s1965_s11 = scalar_select %p1605_p8, 1, 0 }
  0x15   : > { %p1203_p9 = pneg %p1605_p8 }
  0x17   : > { %p1614_p11 = pnand %p1203_p9, %p1957_p1 }
  0x19   : > { %s1290_s18 = scalar_lea.hbm %s1967_s3, 256  ;;  %p1292_p13 = pneg %p1614_p11 }
  0x1a   : > { %p1291_p12 = scmp.ne.s32.totalorder %s1967_s3, %s1290_s18  ;;  %p1297_p5 = scmp.lt.u32.totalorder %s1290_s18, %s1967_s3 }
  0x1c   : > { %p1293_p0 = pnand %p1292_p13, %p1291_p12 }
  0x1e   : > { %p1294_p3 = pneg %p1293_p0 }
  0x20   : > { %p1299_p7 = pnand %p1297_p5, %p1294_p3 }
  0x22   : > { %1302 = shalt.err (!%p1299_p7)
}
  0x23   : > { %s1303_s23 = scalar_lea.vmem %s260_s13, 256  ;;  %p1311_p2 = scmp.lt.s32.totalorder %s260_s13, %s260_s13 }
  0x24   : > { %p1304_p9 = scmp.ne.s32.totalorder %s260_s13, %s1303_s23  ;;  %p1312_p6 = scmp.lt.s32.totalorder %s1303_s23, %s1303_s23 }
  0x26   : > { %p1306_p10 = pnand %p1304_p9, %p1292_p13  ;;  %p1313_p4 = por %p1312_p6, %p1311_p2 }
  0x28   : > { %p1307_p1 = pneg %p1306_p10 }
  0x2a   : > { %p1314_p8 = pnand %p1313_p4, %p1307_p1 }
  0x2c   : > { %1317 = shalt.err (!%p1314_p8)
}
  0x2d   : > { %s1497_s12 = smov 64   ;;  %s1498_s16 = smov 4  }
  0x2e   : > { %1206 = dma.hbm_to_vmem [thread:$0]  (!%p1614_p11), %s1967_s3, 256, %s260_s13, [#allocation6], %s1497_s12, %s1497_s12, %s1498_s16  }
  0x2f   : > { %p42_p1 = scmp.ge.s32.totalorder %s40_s15, 2  ;;  %s49_s19 = sadd.s32 1, %s1482_s26 }
  0x30   : > { %p56_p2 = scmp.ne.s32.totalorder %s1482_s26, %s1478_s25  ;;  %p57_p4 = scmp.eq.s32.totalorder %s1494_s29, 0 }
  0x31   : > { %s1987_s15 = smov (%p42_p1, %s40_s15), 0  ;;  %p1970_p8 = scmp.eq.s32.totalorder %s1584_s30, 1 }
  0x32   : > { %1968 = sst [smem:[#allocation15_spill]] %s1987_s15  ;;  %p1641_p6 = por %p57_p4, %p56_p2 }
  0x33   : > { %p1647_p10 = por %p1970_p8, %p56_p2  ;;  %s44_s14 = ssub.s32 %s1490_s28, %s1987_s15 }
  0x34   : > { %p1222_p12 = scmp.lt.s32.totalorder %s1494_s29, 2  ;;  %p47_p11 = scmp.eq.s32.totalorder %s44_s14, 0 }
  0x35   : > { %s276_s13 = sand.u32 1, %s1482_s26   ;;  %s1147_s12 = sshll.u32 %s1490_s28, 7 }
  0x36   : > { %s1146_s22 = sshll.u32 %s276_s13, 3  ;;  %s1662_s18 = scalar_lea.hbm %s1949_s0, %s1147_s12 }
  0x37   : > { %s1656_s23 = scalar_select %p47_p11, %s1482_s26, %s49_s19  }
  0x38   : > { %s280_s8 = scalar_lea.vmem [#allocation2], %s1146_s22  ;;  %p1668_p13 = pnand %p1222_p12, %p1641_p6 }
  0x39   : > { %s288_s3 = sshll.u32 %s280_s8, 4  ;;  %s277_s19 = scalar_lea.sflag [#allocation3], %s276_s13  ;;  %s1664_s3 = int_to_ptr.vmem [resolvable:$true] %s288_s3 }
  0x3a   : > { %s1318_s15 = scalar_lea.hbm %s1662_s18, 128  ;;  %p1320_p3 = pneg %p1668_p13 }
  0x3b   : > { %p1319_p0 = scmp.ne.s32.totalorder %s1662_s18, %s1318_s15  ;;  %s1323_s12 = scalar_lea.hbm %s1949_s0, 256 }
  0x3c   : > { %p1324_p9 = scmp.lt.u32.totalorder %s1662_s18, %s1949_s0  ;;  %p1325_p1 = scmp.lt.u32.totalorder %s1323_s12, %s1318_s15 }
  0x3d   : > { %p1321_p5 = pnand %p1320_p3, %p1319_p0  ;;  %p1327_p4 = scmp.lt.u32.totalorder %s1318_s15, %s1662_s18 }
  0x3e   : > { %p1326_p2 = por %p1325_p1, %p1324_p9 }
  0x3f   : > { %p1322_p7 = pneg %p1321_p5 }
  0x40   : > { %p1328_p6 = por %p1327_p4, %p1326_p2 }
  0x42   : > { %p1329_p8 = pnand %p1328_p6, %p1322_p7 }
  0x44   : > { %1332 = shalt.err (!%p1329_p8)
}
  0x45   : > { %s1333_s13 = scalar_lea.vmem %s1664_s3, 128  ;;  %s1499_s17 = smov [#allocation2]  }
  0x46   : > { %p1334_p12 = scmp.ne.s32.totalorder %s1664_s3, %s1333_s13  ;;  %s1338_s22 = sshll.u32 %s1499_s17, 4  ;;  %s1339_s22 = int_to_ptr.vmem [resolvable:$false] %s1338_s22 }
  0x47   : > { %s1340_s8 = scalar_lea.vmem %s1339_s22, 256  ;;  %p1341_p5 = scmp.lt.s32.totalorder %s1664_s3, %s1339_s22 }
  0x48   : > { %p1336_p11 = pnand %p1334_p12, %p1320_p3  ;;  %p1342_p9 = scmp.lt.s32.totalorder %s1340_s8, %s1333_s13 }
  0x4a   : > { %p1337_p0 = pneg %p1336_p11  ;;  %p1343_p1 = por %p1342_p9, %p1341_p5 }
  0x4c   : > { %p1344_p2 = pnand %p1343_p1, %p1337_p0 }
  0x4e   : > { %1347 = shalt.err (!%p1344_p2)
}
  0x4f   : > { %1210 = dma.hbm_to_vmem [thread:$0]  (!%p1668_p13), %s1662_s18, 128, %s1664_s3, %s277_s19  }
  0x50   : > { %p1973_p7 = scmp.ne.s32.totalorder %s1965_s11, 0 }
  0x51   : > { %s1700_s15 = sand.u32 (!%p1973_p7), 1, %s1478_s25   ;;  %p1974_p3 = scmp.ne.s32.totalorder (!%p1973_p7), %s1963_s9, 0 }
  0x52   : > { %297 = sbr.rel (%p1973_p7) target bundleno = 925 (0x39d), region = 40  ;;  %s1149_s12 = sshll.u32 (!%p1973_p7), %s1700_s15, 3 }
  0x53   : > { %s300_s20 = scalar_lea.sflag (!%p1973_p7), [#allocation3], %s1700_s15  ;;  %s303_s16 = scalar_lea.vmem (!%p1973_p7), [#allocation2], %s1149_s12 }
  0x59   : > { %1457 = dma.done.wait (%p1974_p3), %s300_s20, 128  }
  0x5a   : > { %1459 = vsyncadd (%p1974_p3), %s300_s20, 4294967168  ;;  %p1975_p4 = scmp.eq.s32.totalorder %s1584_s30, 0 }
  0x5c   : > { %1461 = dma.done.wait (%p1975_p4), [#allocation6], 256   ;;  %p1976_p13 = pmov %p1975_p4 }
  0x5d   : > { %vm352_vm0 = vcmask 261120   ;;  %v349_v0 = vld [vmem:[%s303_s16] sm:$0xff]  ;;  %v1286_v7 = vld [vmem:[#allocation5] sm:$0xff]   ;;  %v1500_v8 = vmov 0.0   ;;  %vm1501_vm1 = vmmov 0   ;;  %v1287_v9 = vld [vmem:[#allocation5 + $0x8] sm:$0xff]   ;;  %v464_v33 = vlaneseq }
  0x5e   : > { %1463 = vsyncadd (%p1976_p13), [#allocation6], 4294967040  ;;  %v353_v1 = vsel %vm352_vm0, %v349_v0, 0.0  ;;  %1183 = vmatprep.subr.bf16.mxu0 %v1500_v8  ;;  %1187 = vmatprep.mubr.msk.bf16.mxu0 %vm1501_vm1, %v1500_v8  ;;  %v1154_v14 = vld [vmem:[%s1950_s1] ss:$0 sm:$0xff]  ;;  %s1502_s13 = smov 104  }
  0x5f   : > { %354 = vadd.xlane.f32.xlu0 %v353_v1  ;;  %1184 = vmatpush3.bf16.msra.mxu0 %v1286_v7  ;;  %v1155_v16 = vld [vmem:[%s1951_s2] ss:$0 sm:$0xff]  ;;  %s1503_s17 = smov 120   ;;  %s1504_s22 = smov 112   ;;  %v1507_v31 = vmov 1983009808  }
  0x60   : > { %1185 = vmatprep.subr.bf16.mxu0 %v1500_v8  ;;  %v1156_v20 = vld [vmem:[%s1953_s4] ss:$0 sm:$0xff]  ;;  %s1505_s8 = smov 96   ;;  %s1506_s12 = smov 64   ;;  %v462_v32 = vunpack.c.l.s4 %v1507_v31  ;;  %v1508_v35 = vmov 1934713408  }
  0x61   : > { %v494_v36 = vunpack.c.l.s4 %v1508_v35  ;;  %v465_v38 = vshrl.u32 %v464_v33, 7  ;;  %s1749_s20 = sshll.u32 %s1700_s15, 4  ;;  %s1756_s16 = sshll.u32 %s1486_s27, 8  ;;  %vm766_vm2 = vcmask 60416  }
  0x62   : > { %v463_v37 = vunpack.c.0.s8 %v462_v32  ;;  %s333_s3 = scalar_lea.vmem [#allocation7], %s1749_s20  ;;  %s1763_s14 = scalar_lea.hbm %s1954_s5, %s1756_s16 }
  0x63   : > { %1186 = vmatpush3.bf16.msra.mxu0 %v1287_v9  ;;  %v495_v41 = vunpack.c.0.s8 %v494_v36  ;;  %s948_s9 = sshll.u32 %s333_s3, 4  ;;  %s924_s27 = scalar_lea.sflag [#allocation4], %s1700_s15  ;;  %s1765_s9 = int_to_ptr.vmem [resolvable:$true] %s948_s9 }
  0x64   : > { %v1732_v42 = vsub.s32 %v463_v37, %v465_v38  ;;  %s1348_s19 = scalar_lea.vmem %s1765_s9, 256 }
  0x65   : > { %v1734_v48 = vsub.s32 %v495_v41, %v465_v38  ;;  %p1349_p6 = scmp.ne.s32.totalorder %s1765_s9, %s1348_s19 }
  0x67   : > { %p1350_p8 = pnand %p1349_p6, %p1647_p10 }
  0x69   : > { %p1351_p12 = pneg %p1350_p8 }
  0xec   : > { %v355_v2 = vpop.xlane.xlu0 %354 }
  0xed   : > { %v357_v3 = vmul.f32 0.03125, %v355_v2 }
  0xef   : > { %v358_v4 = vsub.f32 %v349_v0, %v357_v3 }
  0xf1   : > { %v359_v5 = vmul.f32 %v358_v4, %v358_v4 }
  0xf3   : > { %v360_v6 = vsel %vm352_vm0, %v359_v5, 0.0 }
  0xf4   : > { %361 = vadd.xlane.f32.xlu0 %v360_v6 }
 0x181   : > { %v362_v10 = vpop.xlane.xlu0 %361 }
 0x182   : > { %v363_v11 = vmul.f32 0.03125, %v362_v10 }
 0x184   : > { %v364_v12 = vadd.f32 1e-05, %v363_v11 }
 0x186   : > { %1288 = vrsqrt.f32 %v364_v12 }
 0x190   : > { %v1289_v13 = vpop.eup %1288 }
 0x191   : > { %v366_v15 = vmul.f32 %v1289_v13, %v358_v4 }
 0x193   : > { %v373_v17 = vmul.f32 %v1154_v14, %v366_v15 }
 0x195   : > { %v380_v18 = vadd.f32 %v1155_v16, %v373_v17 }
 0x197   : > { %v381_v19 = vpack.c.bf16 %v380_v18, %v380_v18 }
 0x199   : > { %1188 = vmatmul.mubr.msk.bf16.vlgmr.msra.gmra.mrb[0].mxu0 %vm352_vm0, %v381_v19 }
 0x26c   : > { %v442_v21 = vpop.f32.mrb[0].mxu0 }
 0x26d   : > { %v443_v22 = vadd.f32 %v1156_v20, %v442_v21  ;;  %v1189_v23 = vpop.f32.mrb[1].mxu0 }
 0x26e   : > { %v445_v24 = vpop.f32.mrb[2].mxu0 }
 0x26f   : > { %532 = vrot.lane.b32.xlu0 %v443_v22, %s1502_s13  ;;  %528 = vrot.lane.b32.xlu1 %v443_v22, %s1503_s17  ;;  %v1190_v25 = vpop.f32.mrb[3].mxu0  ;;  %v448_v26 = vmul.f32 0.35355338, %v443_v22 }
 0x273   : > { %530 = vrot.lane.b32.xlu1 %v443_v22, %s1504_s22  ;;  %456 = vrot.lane.b32.xlu0 %v448_v26, %s1502_s13  ;;  %s1509_s13 = smov [#allocation7]  }
 0x277   : > { %534 = vrot.lane.b32.xlu1 %v443_v22, %s1505_s8 }
 0x27b   : > { %614 = vrot.lane.b32.xlu1 %v443_v22, %s1506_s12 }
 0x27f   : > { %450 = vrot.lane.b32.xlu1 %v448_v26, %s1503_s17  ;;  %s1352_s17 = sshll.u32 %s1509_s13, 4  ;;  %s1353_s17 = int_to_ptr.vmem [resolvable:$false] %s1352_s17 }
 0x280   : > { %p1355_p11 = scmp.lt.s32.totalorder %s1765_s9, %s1353_s17 }
 0x283   : > { %453 = vrot.lane.b32.xlu1 %v448_v26, %s1504_s22  ;;  %s1354_s22 = scalar_lea.vmem %s1353_s17, 512 }
 0x284   : > { %p1356_p0 = scmp.lt.s32.totalorder %s1354_s22, %s1348_s19 }
 0x286   : > { %p1357_p5 = por %p1356_p0, %p1355_p11 }
 0x288   : > { %p1358_p9 = pnand %p1357_p5, %p1351_p12 }
 0x2e1   : > { %v529_v27 = vpop.permute.xlu1 %528  ;;  %v533_v28 = vpop.permute.xlu0 %532 }
 0x2e2   : > { %616 = vrot.lane.b32.xlu0 %v529_v27, %s1506_s12  ;;  %536 = vrot.lane.b32.xlu1 %v529_v27, %s1505_s8 }
 0x2e5   : > { %v531_v29 = vpop.permute.xlu1 %530  ;;  %v457_v40 = vpop.permute.xlu0 %456 }
 0x2e6   : > { %620 = vrot.lane.b32.xlu0 %v533_v28, %s1506_s12  ;;  %538 = vrot.lane.b32.xlu1 %v531_v29, %s1505_s8 }
 0x2e9   : > { %v1727_v30 = vpop.permute.xlu1 %534 }
 0x2ea   : > { %540 = vrot.lane.b32.xlu1 %v533_v28, %s1505_s8 }
 0x2ed   : > { %v1729_v34 = vpop.permute.xlu1 %614 }
 0x2ee   : > { %618 = vrot.lane.b32.xlu1 %v531_v29, %s1506_s12 }
 0x2f1   : > { %v451_v39 = vpop.permute.xlu1 %450 }
 0x2f2   : > { %v475_v43 = vcombine.low %v451_v39, %v457_v40  ;;  %v476_v44 = vcombine.high %v451_v39, %v457_v40 }
 0x2f4   : > { %v483_v49 = vrot.slane %v475_v43, %v1732_v42  ;;  %v490_v50 = vrot.slane %v476_v44, %v1732_v42 }
 0x2f5   : > { %v454_v45 = vpop.permute.xlu1 %453 }
 0x2f6   : > { %v459_v46 = vcombine.low %v448_v26, %v454_v45  ;;  %v460_v47 = vcombine.high %v448_v26, %v454_v45 }
 0x2f8   : > { %v467_v51 = vrot.slane %v459_v46, %v1732_v42  ;;  %v474_v52 = vrot.slane %v460_v47, %v1732_v42 }
 0x2fa   : > { %v491_v53 = vcombine.low %v467_v51, %v483_v49  ;;  %v492_v54 = vcombine.high %v467_v51, %v483_v49  ;;  %v507_v55 = vcombine.low %v474_v52, %v490_v50  ;;  %v508_v56 = vcombine.high %v474_v52, %v490_v50 }
 0x2fc   : > { %v499_v57 = vrot.slane %v491_v53, %v1734_v48  ;;  %v506_v58 = vrot.slane %v492_v54, %v1734_v48  ;;  %v515_v59 = vrot.slane %v507_v55, %v1734_v48  ;;  %v522_v60 = vrot.slane %v508_v56, %v1734_v48 }
 0x2fe   : > { %v694_v61 = vcombine.low %v499_v57, %v506_v58  ;;  %v1160_v62 = vcombine.high %v499_v57, %v506_v58  ;;  %v710_v63 = vcombine.low %v515_v59, %v522_v60  ;;  %v1161_v0 = vcombine.high %v515_v59, %v522_v60 }
 0x300   : > { %v701_v1 = vrot.slane %v694_v61, %v1732_v42  ;;  %v709_v2 = vrot.slane %v1160_v62, %v1732_v42  ;;  %v717_v3 = vrot.slane %v710_v63, %v1732_v42  ;;  %v725_v4 = vrot.slane %v1161_v0, %v1732_v42 }
 0x302   : > { %v726_v5 = vcombine.low %v701_v1, %v709_v2  ;;  %v727_v6 = vcombine.high %v701_v1, %v709_v2  ;;  %v742_v7 = vcombine.low %v717_v3, %v725_v4  ;;  %v743_v8 = vcombine.high %v717_v3, %v725_v4 }
 0x304   : > { %v734_v9 = vrot.slane %v726_v5, %v1734_v48  ;;  %v741_v10 = vrot.slane %v727_v6, %v1734_v48  ;;  %v750_v11 = vrot.slane %v742_v7, %v1734_v48  ;;  %v757_v12 = vrot.slane %v743_v8, %v1734_v48 }
 0x306   : > { %v758_v13 = vcombine.low %v734_v9, %v750_v11  ;;  %v759_v14 = vcombine.high %v734_v9, %v750_v11  ;;  %v760_v15 = vcombine.low %v741_v10, %v757_v12  ;;  %v761_v16 = vcombine.high %v741_v10, %v757_v12 }
 0x308   : > { %v762_v17 = vpack.c.bf16 %v758_v13, %v758_v13  ;;  %v763_v18 = vpack.c.bf16 %v759_v14, %v759_v14  ;;  %v764_v19 = vpack.c.bf16 %v760_v15, %v760_v15  ;;  %v765_v20 = vpack.c.bf16 %v761_v16, %v761_v16 }
 0x30a   : > { %767 = vst.msk [vmem:[%s333_s3] sm:$0xf] %vm766_vm2, %v762_v17  ;;  %768 = vst.msk [vmem:[%s333_s3 + $0x4] sm:$0xf] %vm766_vm2, %v763_v18 }
 0x30b   : > { %769 = vst.msk [vmem:[%s333_s3 + $0x8] sm:$0xf] %vm766_vm2, %v764_v19  ;;  %770 = vst.msk [vmem:[%s333_s3 + $0xc] sm:$0xf] %vm766_vm2, %v765_v20 }
 0x30c   : > { %1361 = shalt.err (!%p1358_p9)
}
 0x30d   : > { %s1362_s8 = scalar_lea.hbm %s1763_s14, 256  ;;  %s1366_s18 = scalar_lea.hbm %s1954_s5, 512 }
 0x30e   : > { %p1363_p1 = scmp.ne.s32.totalorder %s1763_s14, %s1362_s8  ;;  %p1367_p3 = scmp.lt.u32.totalorder %s1763_s14, %s1954_s5 }
 0x30f   : > { %p1368_p4 = scmp.lt.u32.totalorder %s1366_s18, %s1362_s8  ;;  %p1370_p6 = scmp.lt.u32.totalorder %s1362_s8, %s1763_s14 }
 0x310   : > { %p1364_p2 = pnand %p1363_p1, %p1647_p10 }
 0x311   : > { %p1369_p13 = por %p1368_p4, %p1367_p3 }
 0x312   : > { %p1365_p7 = pneg %p1364_p2 }
 0x313   : > { %p1371_p8 = por %p1370_p6, %p1369_p13 }
 0x315   : > { %p1372_p12 = pnand %p1371_p8, %p1365_p7 }
 0x317   : > { %1375 = shalt.err (!%p1372_p12)
}
 0x318   : > { %s1510_s19 = smov 4   ;;  %s928_s15 = sand.u32 1, %s1584_s30  }
 0x319   : > { %1197 = dma.vmem_to_hbm [thread:$0]  (%p1647_p10), %s1765_s9, 256, %s1763_s14, %s924_s27, %s1506_s12, %s1506_s12, %s1510_s19  }
 0x31a   : > { %s340_s9 = scalar_lea.vmem [#allocation8], %s1749_s20  ;;  %s1836_s8 = scalar_lea.hbm %s1955_s6, %s1756_s16 }
 0x31b   : > { %s965_s14 = sshll.u32 %s340_s9, 4  ;;  %s1849_s3 = scalar_lea.vmem [#allocation10], %s1749_s20  ;;  %s1838_s14 = int_to_ptr.vmem [resolvable:$true] %s965_s14 }
 0x31c   : > { %s982_s11 = sshll.u32 %s1849_s3, 4  ;;  %s1854_s18 = scalar_lea.sflag [#allocation9], %s928_s15  ;;  %s1889_s11 = int_to_ptr.vmem [resolvable:$true] %s982_s11 }
 0x31d   : > { %s1376_s13 = scalar_lea.vmem %s1838_s14, 256  ;;  %s1511_s17 = smov [#allocation8]  }
 0x31e   : > { %p1377_p11 = scmp.ne.s32.totalorder %s1838_s14, %s1376_s13  ;;  %s1380_s27 = sshll.u32 %s1511_s17, 4  ;;  %s1381_s27 = int_to_ptr.vmem [resolvable:$false] %s1380_s27 }
 0x31f   : > { %p1383_p9 = scmp.lt.s32.totalorder %s1838_s14, %s1381_s27 }
 0x320   : > { %p1378_p0 = pnand %p1377_p11, %p1647_p10 }
 0x322   : > { %p1379_p5 = pneg %p1378_p0 }
 0x354   : > { %v537_v21 = vpop.permute.xlu1 %536  ;;  %v617_v22 = vpop.permute.xlu0 %616 }
 0x358   : > { %v539_v23 = vpop.permute.xlu1 %538  ;;  %v621_v27 = vpop.permute.xlu0 %620 }
 0x359   : > { %v546_v24 = vcombine.low %v1727_v30, %v539_v23  ;;  %v547_v25 = vcombine.high %v1727_v30, %v539_v23  ;;  %v642_v36 = vcombine.low %v617_v22, %v621_v27  ;;  %v643_v37 = vcombine.high %v617_v22, %v621_v27 }
 0x35b   : > { %v554_v31 = vrot.slane %v546_v24, %v1732_v42  ;;  %v561_v32 = vrot.slane %v547_v25, %v1732_v42  ;;  %v650_v50 = vrot.slane %v642_v36, %v1732_v42  ;;  %v657_v51 = vrot.slane %v643_v37, %v1732_v42 }
 0x35c   : > { %v541_v26 = vpop.permute.xlu1 %540 }
 0x35d   : > { %v562_v28 = vcombine.low %v537_v21, %v541_v26  ;;  %v563_v29 = vcombine.high %v537_v21, %v541_v26 }
 0x35f   : > { %v570_v33 = vrot.slane %v562_v28, %v1732_v42  ;;  %v577_v35 = vrot.slane %v563_v29, %v1732_v42 }
 0x360   : > { %v619_v38 = vpop.permute.xlu1 %618 }
 0x361   : > { %v578_v39 = vcombine.low %v554_v31, %v570_v33  ;;  %v579_v40 = vcombine.high %v554_v31, %v570_v33  ;;  %v594_v41 = vcombine.low %v561_v32, %v577_v35  ;;  %v595_v43 = vcombine.high %v561_v32, %v577_v35 }
 0x362   : > { %v626_v30 = vcombine.low %v1729_v34, %v619_v38  ;;  %v627_v44 = vcombine.high %v1729_v34, %v619_v38 }
 0x363   : > { %v586_v45 = vrot.slane %v578_v39, %v1734_v48  ;;  %v593_v46 = vrot.slane %v579_v40, %v1734_v48  ;;  %v602_v47 = vrot.slane %v594_v41, %v1734_v48  ;;  %v609_v49 = vrot.slane %v595_v43, %v1734_v48 }
 0x364   : > { %v634_v52 = vrot.slane %v626_v30, %v1732_v42  ;;  %v641_v53 = vrot.slane %v627_v44, %v1732_v42 }
 0x365   : > { %v771_v54 = vcombine.low %v586_v45, %v593_v46  ;;  %v1162_v55 = vcombine.high %v586_v45, %v593_v46  ;;  %v787_v56 = vcombine.low %v602_v47, %v609_v49  ;;  %v1163_v34 = vcombine.high %v602_v47, %v609_v49 }
 0x366   : > { %v658_v57 = vcombine.low %v634_v52, %v650_v50  ;;  %v659_v58 = vcombine.high %v634_v52, %v650_v50  ;;  %v674_v59 = vcombine.low %v641_v53, %v657_v51  ;;  %v675_v60 = vcombine.high %v641_v53, %v657_v51 }
 0x367   : > { %v778_v61 = vrot.slane %v771_v54, %v1732_v42  ;;  %v786_v62 = vrot.slane %v1162_v55, %v1732_v42  ;;  %v794_v63 = vrot.slane %v787_v56, %v1732_v42  ;;  %v802_v0 = vrot.slane %v1163_v34, %v1732_v42 }
 0x368   : > { %v666_v1 = vrot.slane %v658_v57, %v1734_v48  ;;  %v673_v2 = vrot.slane %v659_v58, %v1734_v48  ;;  %v682_v3 = vrot.slane %v674_v59, %v1734_v48  ;;  %v689_v4 = vrot.slane %v675_v60, %v1734_v48 }
 0x369   : > { %v803_v5 = vcombine.low %v778_v61, %v786_v62  ;;  %v804_v6 = vcombine.high %v778_v61, %v786_v62  ;;  %v819_v7 = vcombine.low %v794_v63, %v802_v0  ;;  %v820_v8 = vcombine.high %v794_v63, %v802_v0 }
 0x36a   : > { %v847_v9 = vcombine.low %v666_v1, %v673_v2  ;;  %v1164_v10 = vcombine.high %v666_v1, %v673_v2  ;;  %v863_v11 = vcombine.low %v682_v3, %v689_v4  ;;  %v1165_v12 = vcombine.high %v682_v3, %v689_v4 }
 0x36b   : > { %v811_v13 = vrot.slane %v803_v5, %v1734_v48  ;;  %v818_v14 = vrot.slane %v804_v6, %v1734_v48  ;;  %v827_v15 = vrot.slane %v819_v7, %v1734_v48  ;;  %v834_v16 = vrot.slane %v820_v8, %v1734_v48 }
 0x36c   : > { %v854_v17 = vrot.slane %v847_v9, %v1732_v42  ;;  %v862_v18 = vrot.slane %v1164_v10, %v1732_v42  ;;  %v870_v19 = vrot.slane %v863_v11, %v1732_v42  ;;  %v878_v20 = vrot.slane %v1165_v12, %v1732_v42 }
 0x36d   : > { %v835_v21 = vcombine.low %v811_v13, %v827_v15  ;;  %v836_v22 = vcombine.high %v811_v13, %v827_v15  ;;  %v837_v23 = vcombine.low %v818_v14, %v834_v16  ;;  %v838_v24 = vcombine.high %v818_v14, %v834_v16 }
 0x36e   : > { %v879_v25 = vcombine.low %v854_v17, %v862_v18  ;;  %v880_v26 = vcombine.high %v854_v17, %v862_v18  ;;  %v895_v27 = vcombine.low %v870_v19, %v878_v20  ;;  %v896_v28 = vcombine.high %v870_v19, %v878_v20 }
 0x36f   : > { %v839_v29 = vpack.c.bf16 %v835_v21, %v835_v21  ;;  %v840_v31 = vpack.c.bf16 %v836_v22, %v836_v22  ;;  %v841_v32 = vpack.c.bf16 %v837_v23, %v837_v23  ;;  %v842_v33 = vpack.c.bf16 %v838_v24, %v838_v24 }
 0x370   : > { %v887_v42 = vrot.slane %v879_v25, %v1734_v48  ;;  %v894_v35 = vrot.slane %v880_v26, %v1734_v48  ;;  %v903_v36 = vrot.slane %v895_v27, %v1734_v48  ;;  %v910_v37 = vrot.slane %v896_v28, %v1734_v48 }
 0x371   : > { %843 = vst.msk [vmem:[%s340_s9] sm:$0xf] %vm766_vm2, %v839_v29  ;;  %844 = vst.msk [vmem:[%s340_s9 + $0x4] sm:$0xf] %vm766_vm2, %v840_v31 }
 0x372   : > { %845 = vst.msk [vmem:[%s340_s9 + $0x8] sm:$0xf] %vm766_vm2, %v841_v32  ;;  %846 = vst.msk [vmem:[%s340_s9 + $0xc] sm:$0xf] %vm766_vm2, %v842_v33  ;;  %v911_v38 = vcombine.low %v887_v42, %v903_v36  ;;  %v912_v39 = vcombine.high %v887_v42, %v903_v36  ;;  %v913_v40 = vcombine.low %v894_v35, %v910_v37  ;;  %s1382_s9 = scalar_lea.vmem %s1381_s27, 512 }
 0x373   : > { %v914_v41 = vcombine.high %v894_v35, %v910_v37  ;;  %p1384_p1 = scmp.lt.s32.totalorder %s1382_s9, %s1376_s13 }
 0x375   : > { %p1385_p2 = por %p1384_p1, %p1383_p9 }
 0x377   : > { %p1386_p7 = pnand %p1385_p2, %p1379_p5 }
 0x379   : > { %1389 = shalt.err (!%p1386_p7)
}
 0x37a   : > { %s1390_s30 = scalar_lea.hbm %s1836_s8, 256  ;;  %s1394_s22 = scalar_lea.hbm %s1955_s6, 512 }
 0x37b   : > { %p1391_p3 = scmp.ne.s32.totalorder %s1836_s8, %s1390_s30  ;;  %p1395_p6 = scmp.lt.u32.totalorder %s1836_s8, %s1955_s6 }
 0x37c   : > { %p1396_p8 = scmp.lt.u32.totalorder %s1394_s22, %s1390_s30  ;;  %p1398_p11 = scmp.lt.u32.totalorder %s1390_s30, %s1836_s8 }
 0x37d   : > { %p1392_p4 = pnand %p1391_p3, %p1647_p10 }
 0x37e   : > { %p1397_p12 = por %p1396_p8, %p1395_p6 }
 0x37f   : > { %p1393_p13 = pneg %p1392_p4 }
 0x380   : > { %p1399_p0 = por %p1398_p11, %p1397_p12 }
 0x382   : > { %p1400_p5 = pnand %p1399_p0, %p1393_p13 }
 0x384   : > { %1403 = shalt.err (!%p1400_p5)
}
 0x385   : > { %1198 = dma.vmem_to_hbm [thread:$0]  (%p1647_p10), %s1838_s14, 256, %s1836_s8, %s1854_s18, %s1506_s12, %s1506_s12, %s1510_s19   ;;  %v915_v48 = vpack.c.bf16 %v911_v38, %v911_v38  ;;  %v916_v43 = vpack.c.bf16 %v912_v39, %v912_v39  ;;  %v917_v30 = vpack.c.bf16 %v913_v40, %v913_v40  ;;  %v918_v44 = vpack.c.bf16 %v914_v41, %v914_v41 }
 0x386   : > { %s1885_s30 = scalar_lea.hbm %s1956_s7, %s1756_s16  ;;  %s1404_s14 = scalar_lea.vmem %s1889_s11, 256 }
 0x387   : > { %919 = vst.msk [vmem:[%s1849_s3] sm:$0xf] %vm766_vm2, %v915_v48  ;;  %920 = vst.msk [vmem:[%s1849_s3 + $0x4] sm:$0xf] %vm766_vm2, %v916_v43  ;;  %p1405_p9 = scmp.ne.s32.totalorder %s1889_s11, %s1404_s14  ;;  %s1512_s16 = smov [#allocation10]  }
 0x388   : > { %921 = vst.msk [vmem:[%s1849_s3 + $0x8] sm:$0xf] %vm766_vm2, %v917_v30  ;;  %922 = vst.msk [vmem:[%s1849_s3 + $0xc] sm:$0xf] %vm766_vm2, %v918_v44  ;;  %s1408_s8 = sshll.u32 %s1512_s16, 4  ;;  %s1409_s8 = int_to_ptr.vmem [resolvable:$false] %s1408_s8 }
 0x389   : > { %p1406_p1 = pnand %p1405_p9, %p1647_p10  ;;  %s1410_s20 = scalar_lea.vmem %s1409_s8, 512 }
 0x38a   : > { %p1411_p7 = scmp.lt.s32.totalorder %s1889_s11, %s1409_s8  ;;  %p1412_p3 = scmp.lt.s32.totalorder %s1410_s20, %s1404_s14 }
 0x38b   : > { %p1407_p2 = pneg %p1406_p1 }
 0x38c   : > { %p1413_p4 = por %p1412_p3, %p1411_p7 }
 0x38e   : > { %p1414_p13 = pnand %p1413_p4, %p1407_p2 }
 0x390   : > { %1417 = shalt.err (!%p1414_p13)
}
 0x391   : > { %s1418_s3 = scalar_lea.hbm %s1885_s30, 256  ;;  %s1422_s17 = scalar_lea.hbm %s1956_s7, 512 }
 0x392   : > { %p1419_p6 = scmp.ne.s32.totalorder %s1885_s30, %s1418_s3  ;;  %p1423_p11 = scmp.lt.u32.totalorder %s1885_s30, %s1956_s7 }
 0x393   : > { %p1424_p0 = scmp.lt.u32.totalorder %s1422_s17, %s1418_s3  ;;  %p1426_p9 = scmp.lt.u32.totalorder %s1418_s3, %s1885_s30 }
 0x394   : > { %p1420_p8 = pnand %p1419_p6, %p1647_p10 }
 0x395   : > { %p1425_p5 = por %p1424_p0, %p1423_p11 }
 0x396   : > { %p1421_p12 = pneg %p1420_p8 }
 0x397   : > { %p1427_p1 = por %p1426_p9, %p1425_p5 }
 0x399   : > { %p1428_p2 = pnand %p1427_p1, %p1421_p12 }
 0x39b   : > { %1431 = shalt.err (!%p1428_p2)
}
 0x39c   : > { %1199 = dma.vmem_to_hbm [thread:$0]  (%p1647_p10), %s1889_s11, 256, %s1885_s30, %s1854_s18, %s1506_s12, %s1506_s12, %s1510_s19  }
 0x39d PF: > { %s997_s9 = sand.u32 1, %s1474_s24   ;;  %p1977_p7 = scmp.ne.s32.totalorder %s1964_s10, 0 }
 0x39e   : > { %p1978_p3 = scmp.ge.s32.totalorder %s1494_s29, 2  ;;  %s998_s14 = scalar_lea.sflag [#allocation4], %s997_s9 }
 0x3a0   : > { %p1212_p4 = pnand %p1978_p3, %p1977_p7 }
 0x3a2   : > { %1465 = dma.done.wait (!%p1212_p4), %s998_s14, 256  }
 0x3a3   : > { %1467 = vsyncadd (!%p1212_p4), %s998_s14, 4294967040  ;;  %s1979_s21 = sadd.s32 4294967294, %s1494_s29  }
 0x3a4   : > { %s1006_s16 = sand.u32 1, %s1979_s21  }
 0x3a5   : > { %s1007_s8 = scalar_lea.sflag [#allocation9], %s1006_s16 }
 0x3a6   : > { %1469 = dma.done.wait (!%p1212_p4), %s1007_s8, 512  }
 0x3a7   : > { %1471 = vsyncadd (!%p1212_p4), %s1007_s8, 4294966784  ;;  %s28_s29 = sadd.s32 1, %s1494_s29   ;;  %s1980_s12 = sld [smem:[#allocation15_spill]] }
 0x3a8   : > { %p25_p10 = scmp.ge.s32.totalorder %s28_s29, 4   ;;  %s1981_s24 = smov %s1478_s25 }
 0x3a9   : > { %s1982_s25 = smov %s1482_s26  ;;  %s1983_s26 = smov %s1656_s23 }
 0x3aa   : > { %s1984_s27 = smov %s1490_s28  ;;  %27 = sbr.rel (!%p25_p10) target bundleno = 11 (0xb), region = 121 }
 0x3ad   : > { %s1985_s28 = smov %s1980_s12 }
 0x3b1   :  { %1021 = vsyncpa [#allocation3], 1 }
 0x3b2   :  { %1023 = vsyncpa [#allocation3 + $0x1], 1 }
 0x3b3   :  { %1024 = vsyncpa [#allocation6], 1 }
 0x3b4   :  { %1025 = vsyncpa [#allocation4], 1 }
 0x3b5   :  { %1027 = vsyncpa [#allocation4 + $0x1], 1 }
 0x3b6   :  { %1028 = vsyncpa [#allocation9], 1 }
 0x3b7   :  { %1030 = vsyncpa [#allocation9 + $0x1], 1 }

</bundles_post_ra>
